<compile_context>
chip_gen: v6e
topology: v6e:2x2x1
jax: 0.10.0
libtpu: 0.0.40
codegen_flags: <defaults>
</compile_context>

<pallas_src>
import functools

import jax
import jax.numpy as jnp
from jax import lax
from jax.experimental import pallas as pl
from jax.experimental.pallas import tpu as pltpu


_LANE_CANDIDATES = (1024, 512, 256, 128)   # lane-dense last-dim choices
_DEFAULT_TILE_ELEMS = 512 * 1024           # ~2 MiB per input tile at f32
_NUM_SPLITS = 2                            # leading "parallel" axis (v7x megacore)


def _mask_mse_kernel(pred_ref, gt_ref, mask_ref, num_out_ref, den_out_ref,
                     num_acc, den_acc, *,
                     tiles_per_split, tile_rows, acc_rows, lanes,
                     valid_rows, needs_row_mask):
    j = pl.program_id(1)

    # Reset the per-split vector accumulators at the start of each split's
    # sequence over the "arbitrary" reduction axis.
    @pl.when(j == 0)
    def _():
        num_acc[...] = jnp.zeros_like(num_acc)
        den_acc[...] = jnp.zeros_like(den_acc)

    # Stream native dtypes; widen in-register (free VPU work under DMA).
    pred = pred_ref[...].astype(jnp.float32)
    gt = gt_ref[...].astype(jnp.float32)
    m = mask_ref[...].astype(jnp.float32)

    diff = pred - gt
    num_c = diff * diff * m
    den_c = m

    if needs_row_mask:
        # Partial last tile and/or excess (fully out-of-range) tiles from the
        # 2-way split: zero out rows that do not correspond to real data.
        t_logical = pl.program_id(0) * tiles_per_split + j
        row = (t_logical * tile_rows
               + lax.broadcasted_iota(jnp.int32, (tile_rows, lanes), 0))
        valid = row < valid_rows
        num_c = jnp.where(valid, num_c, 0.0)
        den_c = jnp.where(valid, den_c, 0.0)

    # Fold the tile into an (acc_rows, lanes) slab: pure VPU adds, no XLU,
    # no per-step scalar/SMEM round trip.
    if tile_rows == acc_rows:
        num_acc[...] += num_c
        den_acc[...] += den_c
    else:
        num_acc[...] += num_c.reshape(-1, acc_rows, lanes).sum(axis=0)
        den_acc[...] += den_c.reshape(-1, acc_rows, lanes).sum(axis=0)

    # Emit this split's partial sums once, at the end of its sequence.
    @pl.when(j == pl.num_programs(1) - 1)
    def _():
        num_out_ref[0] = num_acc[...]
        den_out_ref[0] = den_acc[...]


def mask_mse_loss(pred_heat, gt_heat, mask, *,
                  target_tile_elems=_DEFAULT_TILE_ELEMS):
    """loss = sum((pred - gt[:,None])**2 * mask[:,None]) / sum(mask). f32 scalar."""
    N, C, H, W = pred_heat.shape
    assert C == 1, "MaskMSELoss expects a single-channel prediction"
    assert gt_heat.shape == (N, H, W) and mask.shape == (N, H, W)

    total = N * H * W

    # Stream the mask natively; bool -> uint8 (1 byte/elem of HBM traffic).
    if mask.dtype == jnp.bool_:
        mask = mask.astype(jnp.uint8)

    pred_flat = pred_heat.reshape(total)
    gt_flat = gt_heat.reshape(total)
    mask_flat = mask.reshape(total)

    # Lane-dense view: last dim a multiple of 128 so every vreg load is
    # unmasked.  Pad with zeros only if no candidate divides `total`.
    lanes = next((c for c in _LANE_CANDIDATES if total % c == 0), None)
    if lanes is None:
        lanes = _LANE_CANDIDATES[0]
        padded_total = pl.cdiv(total, lanes) * lanes
        pad = padded_total - total
        pred_flat = jnp.pad(pred_flat, (0, pad))
        gt_flat = jnp.pad(gt_flat, (0, pad))
        mask_flat = jnp.pad(mask_flat, (0, pad))
    else:
        padded_total = total

    R = padded_total // lanes
    pred2d = pred_flat.reshape(R, lanes)
    gt2d = gt_flat.reshape(R, lanes)
    mask2d = mask_flat.reshape(R, lanes)

    # ~2 MiB (f32) per-input tile: large enough to amortize per-grid-step
    # overhead (~85% of HBM roofline), small enough that 3 inputs x 2 pipeline
    # buffers stay well under the 32 MiB budget set below on every generation.
    tile_rows = max(8, (target_tile_elems // lanes) // 8 * 8)
    if tile_rows >= R:
        tile_rows = R                      # block == full dim is always legal
    num_tiles = pl.cdiv(R, tile_rows)
    tiles_per_split = pl.cdiv(num_tiles, _NUM_SPLITS)
    needs_row_mask = (_NUM_SPLITS * tiles_per_split * tile_rows != R)

    # Per-split accumulator height: fold tiles down to 8 sublanes when possible.
    acc_rows = 8 if tile_rows % 8 == 0 else tile_rows

    def in_index(i, j):
        t = i * tiles_per_split + j
        # Clamp a split's excess tiles onto a real block (their rows are zeroed
        # in-kernel), so the DMA source never leaves the array.
        return (jnp.minimum(t, num_tiles - 1), 0)

    in_spec = pl.BlockSpec((tile_rows, lanes), in_index)
    out_spec = pl.BlockSpec((1, acc_rows, lanes), lambda i, j: (i, 0, 0))
    out_sds = jax.ShapeDtypeStruct((_NUM_SPLITS, acc_rows, lanes), jnp.float32)

    kernel = functools.partial(
        _mask_mse_kernel,
        tiles_per_split=tiles_per_split,
        tile_rows=tile_rows,
        acc_rows=acc_rows,
        lanes=lanes,
        valid_rows=R,
        needs_row_mask=needs_row_mask,
    )

    bytes_accessed = (pred2d.size * pred2d.dtype.itemsize
                      + gt2d.size * gt2d.dtype.itemsize
                      + mask2d.size * mask2d.dtype.itemsize
                      + 2 * _NUM_SPLITS * acc_rows * lanes * 4)

    num_out, den_out = pl.pallas_call(
        kernel,
        out_shape=(out_sds, out_sds),
        grid_spec=pltpu.PrefetchScalarGridSpec(
            num_scalar_prefetch=0,
            grid=(_NUM_SPLITS, tiles_per_split),
            in_specs=[in_spec, in_spec, in_spec],
            out_specs=[out_spec, out_spec],
            scratch_shapes=[pltpu.VMEM((acc_rows, lanes), jnp.float32),
                            pltpu.VMEM((acc_rows, lanes), jnp.float32)],
        ),
        compiler_params=pltpu.CompilerParams(
            dimension_semantics=("parallel", "arbitrary"),
            vmem_limit_bytes=32 * 1024 * 1024,
        ),
        cost_estimate=pl.CostEstimate(
            flops=5 * total, transcendentals=0, bytes_accessed=bytes_accessed),
    )(pred2d, gt2d, mask2d)

    # Tiny final cross-lane reduce + divide (kept outside the kernel so the
    # grid's leading axis stays megacore-parallel on v7x).
    return jnp.sum(num_out) / jnp.sum(den_out)


def _reference(pred_heat, gt_heat, mask):
    diff = pred_heat.astype(jnp.float32) - gt_heat[:, None].astype(jnp.float32)
    m = mask[:, None].astype(jnp.float32)
    return jnp.sum(diff * diff * m) / jnp.sum(m)


if __name__ == "__main__":
    key = jax.random.PRNGKey(0)

    def make_case(k, n, h, w):
        k1, k2, k3 = jax.random.split(k, 3)
        pred = jax.random.normal(k1, (n, 1, h, w), dtype=jnp.float32)
        gt = jax.random.normal(k2, (n, h, w), dtype=jnp.float32)
        m = (jax.random.uniform(k3, (n, h, w)) > 0.5).astype(jnp.float32)
        return pred, gt, m

    k0, k1, k2 = jax.random.split(key, 3)

    # Case 1: small shape matching the module's typical use (single tile).
    pred, gt, m = make_case(k0, 2, 16, 16)
    loss = jax.block_until_ready(mask_mse_loss(pred, gt, m))
    ref = _reference(pred, gt, m)
    assert jnp.allclose(loss, ref, rtol=1e-5, atol=1e-6), (loss, ref)

    # Case 2: small tile size forced to exercise multi-tile pipelining, the
    # sublane fold path and the masked partial last tile.
    pred, gt, m = make_case(k1, 2, 61, 256)
    loss = jax.block_until_ready(
        mask_mse_loss(pred, gt, m, target_tile_elems=8192))
    ref = _reference(pred, gt, m)
    assert jnp.allclose(loss, ref, rtol=1e-5, atol=1e-6), (loss, ref)

    # Case 3: element count not a multiple of 128 -> zero-padding path.
    pred, gt, m = make_case(k2, 1, 5, 7)
    loss = jax.block_until_ready(mask_mse_loss(pred, gt, m))
    ref = _reference(pred, gt, m)
    assert jnp.allclose(loss, ref, rtol=1e-5, atol=1e-6), (loss, ref)

    print("KERNEL_OK")
</pallas_src>

<mosaic_0001>
module attributes {stable_mosaic.version = 11 : i64} {
  func.func @_mask_mse_kernel(%arg0: i32, %arg1: i32, %arg2: memref<1x512xf32, #tpu.memory_space<vmem>>, %arg3: memref<1x512xf32, #tpu.memory_space<vmem>>, %arg4: memref<1x512xf32, #tpu.memory_space<vmem>>, %arg5: memref<1x1x512xf32, #tpu.memory_space<vmem>>, %arg6: memref<1x1x512xf32, #tpu.memory_space<vmem>>, %arg7: memref<1x512xf32, #tpu.memory_space<vmem>>, %arg8: memref<1x512xf32, #tpu.memory_space<vmem>>) attributes {dimension_semantics = [#tpu.dimension_semantics<parallel>, #tpu.dimension_semantics<arbitrary>], iteration_bounds = array<i64: 2, 1>, scalar_prefetch = 0 : i64, scratch_operands = 2 : i64, tpu.core_type = #tpu.core_type<tc>, window_params = [{transform_indices = @transform_0, window_bounds = array<i64: 1, 512>}, {transform_indices = @transform_1, window_bounds = array<i64: 1, 512>}, {transform_indices = @transform_2, window_bounds = array<i64: 1, 512>}, {transform_indices = @transform_3, window_bounds = array<i64: 1, 1, 512>}, {transform_indices = @transform_4, window_bounds = array<i64: 1, 1, 512>}]} {
    %c0_i32 = arith.constant 0 : i32
    %0 = arith.cmpi eq, %arg1, %c0_i32 : i32
    %1 = arith.extui %0 : i1 to i32
    %c0_i32_0 = arith.constant 0 : i32
    %2 = arith.cmpi ne, %1, %c0_i32_0 : i32
    scf.if %2 {
      %cst_19 = arith.constant 0.000000e+00 : f32
      %30 = vector.broadcast %cst_19 : f32 to vector<1x512xf32>
      %c0_20 = arith.constant 0 : index
      %c0_21 = arith.constant 0 : index
      %31 = vector.load %arg7[%c0_20, %c0_21] : memref<1x512xf32, #tpu.memory_space<vmem>>, vector<1x512xf32>
      tpu.vector_store %arg7[%c0_20, %c0_21], %30 {strides = array<i32>} : memref<1x512xf32, #tpu.memory_space<vmem>>, vector<1x512xf32>,
      %cst_22 = arith.constant 0.000000e+00 : f32
      %32 = vector.broadcast %cst_22 : f32 to vector<1x512xf32>
      %c0_23 = arith.constant 0 : index
      %c0_24 = arith.constant 0 : index
      %33 = vector.load %arg8[%c0_23, %c0_24] : memref<1x512xf32, #tpu.memory_space<vmem>>, vector<1x512xf32>
      tpu.vector_store %arg8[%c0_23, %c0_24], %32 {strides = array<i32>} : memref<1x512xf32, #tpu.memory_space<vmem>>, vector<1x512xf32>,
    } else {
    }
    %c0 = arith.constant 0 : index
    %c0_1 = arith.constant 0 : index
    %3 = vector.load %arg2[%c0, %c0_1] : memref<1x512xf32, #tpu.memory_space<vmem>>, vector<1x512xf32>
    %c0_2 = arith.constant 0 : index
    %c0_3 = arith.constant 0 : index
    %4 = vector.load %arg3[%c0_2, %c0_3] : memref<1x512xf32, #tpu.memory_space<vmem>>, vector<1x512xf32>
    %c0_4 = arith.constant 0 : index
    %c0_5 = arith.constant 0 : index
    %5 = vector.load %arg4[%c0_4, %c0_5] : memref<1x512xf32, #tpu.memory_space<vmem>>, vector<1x512xf32>
    %6 = arith.subf %3, %4 : vector<1x512xf32>
    %7 = arith.mulf %6, %6 : vector<1x512xf32>
    %8 = arith.mulf %7, %5 : vector<1x512xf32>
    %c1_i32 = arith.constant 1 : i32
    %9 = arith.muli %arg0, %c1_i32 : i32
    %10 = arith.addi %9, %arg1 : i32
    %c1_i32_6 = arith.constant 1 : i32
    %11 = arith.muli %10, %c1_i32_6 : i32
    %12 = tpu.iota {dimensions = array<i32: 0>} : vector<1x512xi32>
    %13 = vector.broadcast %11 : i32 to vector<1x512xi32>
    %14 = arith.addi %13, %12 : vector<1x512xi32>
    %c1_i32_7 = arith.constant 1 : i32
    %15 = vector.broadcast %c1_i32_7 : i32 to vector<1x512xi32>
    %16 = arith.cmpi slt, %14, %15 : vector<1x512xi32>
    %cst = arith.constant 0.000000e+00 : f32
    %17 = vector.broadcast %cst : f32 to vector<1x512xf32>
    %18 = arith.select %16, %8, %17 : vector<1x512xi1>, vector<1x512xf32>
    %cst_8 = arith.constant 0.000000e+00 : f32
    %19 = vector.broadcast %cst_8 : f32 to vector<1x512xf32>
    %20 = arith.select %16, %5, %19 : vector<1x512xi1>, vector<1x512xf32>
    %c0_9 = arith.constant 0 : index
    %c0_10 = arith.constant 0 : index
    %21 = vector.load %arg7[%c0_9, %c0_10] : memref<1x512xf32, #tpu.memory_space<vmem>>, vector<1x512xf32>
    %22 = arith.addf %21, %18 : vector<1x512xf32>
    %c0_11 = arith.constant 0 : index
    %c0_12 = arith.constant 0 : index
    %23 = vector.load %arg7[%c0_11, %c0_12] : memref<1x512xf32, #tpu.memory_space<vmem>>, vector<1x512xf32>
    tpu.vector_store %arg7[%c0_11, %c0_12], %22 {strides = array<i32>} : memref<1x512xf32, #tpu.memory_space<vmem>>, vector<1x512xf32>,
    %c0_13 = arith.constant 0 : index
    %c0_14 = arith.constant 0 : index
    %24 = vector.load %arg8[%c0_13, %c0_14] : memref<1x512xf32, #tpu.memory_space<vmem>>, vector<1x512xf32>
    %25 = arith.addf %24, %20 : vector<1x512xf32>
    %c0_15 = arith.constant 0 : index
    %c0_16 = arith.constant 0 : index
    %26 = vector.load %arg8[%c0_15, %c0_16] : memref<1x512xf32, #tpu.memory_space<vmem>>, vector<1x512xf32>
    tpu.vector_store %arg8[%c0_15, %c0_16], %25 {strides = array<i32>} : memref<1x512xf32, #tpu.memory_space<vmem>>, vector<1x512xf32>,
    %c0_i32_17 = arith.constant 0 : i32
    %27 = arith.cmpi eq, %arg1, %c0_i32_17 : i32
    %28 = arith.extui %27 : i1 to i32
    %c0_i32_18 = arith.constant 0 : i32
    %29 = arith.cmpi ne, %28, %c0_i32_18 : i32
    scf.if %29 {
      %c0_19 = arith.constant 0 : index
      %c0_20 = arith.constant 0 : index
      %30 = vector.load %arg7[%c0_19, %c0_20] : memref<1x512xf32, #tpu.memory_space<vmem>>, vector<1x512xf32>
      %c0_21 = arith.constant 0 : index
      %c0_22 = arith.constant 0 : index
      %c0_23 = arith.constant 0 : index
      %31 = vector.load %arg5[%c0_21, %c0_22, %c0_23] : memref<1x1x512xf32, #tpu.memory_space<vmem>>, vector<1x1x512xf32>
      %32 = vector.shape_cast %31 : vector<1x1x512xf32> to vector<1x512xf32>
      %33 = vector.shape_cast %30 : vector<1x512xf32> to vector<1x1x512xf32>
      tpu.vector_store %arg5[%c0_21, %c0_22, %c0_23], %33 {strides = array<i32>} : memref<1x1x512xf32, #tpu.memory_space<vmem>>, vector<1x1x512xf32>,
      %c0_24 = arith.constant 0 : index
      %c0_25 = arith.constant 0 : index
      %34 = vector.load %arg8[%c0_24, %c0_25] : memref<1x512xf32, #tpu.memory_space<vmem>>, vector<1x512xf32>
      %c0_26 = arith.constant 0 : index
      %c0_27 = arith.constant 0 : index
      %c0_28 = arith.constant 0 : index
      %35 = vector.load %arg6[%c0_26, %c0_27, %c0_28] : memref<1x1x512xf32, #tpu.memory_space<vmem>>, vector<1x1x512xf32>
      %36 = vector.shape_cast %35 : vector<1x1x512xf32> to vector<1x512xf32>
      %37 = vector.shape_cast %34 : vector<1x512xf32> to vector<1x1x512xf32>
      tpu.vector_store %arg6[%c0_26, %c0_27, %c0_28], %37 {strides = array<i32>} : memref<1x1x512xf32, #tpu.memory_space<vmem>>, vector<1x1x512xf32>,
    } else {
    }
    return
  }
  func.func @transform_0(%arg0: i32, %arg1: i32) -> (i32, i32) {
    %c1_i32 = arith.constant 1 : i32
    %0 = arith.muli %arg0, %c1_i32 : i32
    %1 = arith.addi %0, %arg1 : i32
    %c0_i32 = arith.constant 0 : i32
    %2 = arith.minsi %1, %c0_i32 : i32
    %c0_i32_0 = arith.constant 0 : i32
    %c0_i32_1 = arith.constant 0 : i32
    return %2, %c0_i32_0 : i32, i32
  }
  func.func @transform_1(%arg0: i32, %arg1: i32) -> (i32, i32) {
    %c1_i32 = arith.constant 1 : i32
    %0 = arith.muli %arg0, %c1_i32 : i32
    %1 = arith.addi %0, %arg1 : i32
    %c0_i32 = arith.constant 0 : i32
    %2 = arith.minsi %1, %c0_i32 : i32
    %c0_i32_0 = arith.constant 0 : i32
    %c0_i32_1 = arith.constant 0 : i32
    return %2, %c0_i32_0 : i32, i32
  }
  func.func @transform_2(%arg0: i32, %arg1: i32) -> (i32, i32) {
    %c1_i32 = arith.constant 1 : i32
    %0 = arith.muli %arg0, %c1_i32 : i32
    %1 = arith.addi %0, %arg1 : i32
    %c0_i32 = arith.constant 0 : i32
    %2 = arith.minsi %1, %c0_i32 : i32
    %c0_i32_0 = arith.constant 0 : i32
    %c0_i32_1 = arith.constant 0 : i32
    return %2, %c0_i32_0 : i32, i32
  }
  func.func @transform_3(%arg0: i32, %arg1: i32) -> (i32, i32, i32) {
    %c0_i32 = arith.constant 0 : i32
    %c0_i32_0 = arith.constant 0 : i32
    %c0_i32_1 = arith.constant 0 : i32
    return %arg0, %c0_i32, %c0_i32_0 : i32, i32, i32
  }
  func.func @transform_4(%arg0: i32, %arg1: i32) -> (i32, i32, i32) {
    %c0_i32 = arith.constant 0 : i32
    %c0_i32_0 = arith.constant 0 : i32
    %c0_i32_1 = arith.constant 0 : i32
    return %arg0, %c0_i32, %c0_i32_0 : i32, i32, i32
  }
}

</mosaic_0001>

<bundles_post_ra>
// kernel: tpu_custom_call.1
= control target key start
LH: loop header
LB: loop body
LE: loop exit
PB: predicated region body
PF: predicated region fallthrough
CT: control target
= control target key end

     0   :  { %s1351_s0 = inlined_call_operand.hbm [shape: f32[1,512], index: 0, kind: input, shape index: {}]   ;;  %s1352_s1 = inlined_call_operand.hbm [shape: f32[1,512], index: 1, kind: input, shape index: {}]   ;;  %s1353_s2 = inlined_call_operand.hbm [shape: f32[1,512], index: 2, kind: input, shape index: {}]   ;;  %s1354_s3 = inlined_call_operand.hbm [shape: f32[2,1,512], index: 3, kind: output, shape index: {0}]   ;;  %s1355_s4 = inlined_call_operand.hbm [shape: f32[2,1,512], index: 4, kind: output, shape index: {1}]  }
   0x1   :  { %1360 = sst [smem:[#allocation19_spill]] %s1352_s1 }
   0x2   :  { %10 = vsyncpa [#allocation5], 0 }
   0x3   :  { %12 = vsyncpa [#allocation5 + $0x1], 0 }
   0x4   :  { %13 = vsyncpa [#allocation8], 0 }
   0x5   :  { %15 = vsyncpa [#allocation8 + $0x1], 0 }
   0x6   :  { %16 = vsyncpa [#allocation6], 0 }
   0x7   :  { %18 = vsyncpa [#allocation6 + $0x1], 0 }
   0x8   :  { %19 = vsyncpa [#allocation12], 0 }
   0x9   :  { %21 = vsyncpa [#allocation12 + $0x1], 0  ;;  %s1068_s15 = smov 0   ;;  %s1070_s16 = smov 0  }
   0xa   :  { %s1072_s17 = smov 0   ;;  %s1074_s18 = smov 0  }
   0xb   :  { %s1076_s19 = smov 0   ;;  %s1078_s20 = smov 0  }
   0xc   :  { %s1080_s21 = smov 0   ;;  %s1082_s22 = smov 0  }
   0xd LB: > { %1361 = sst [smem:[#allocation17_spill]] %s1030_s21  ;;  %s1107_s23 = sadd.s32 4294967295, %s1034_s22   ;;  %s1034_s22 = sphi %s1082_s22, %s27_s22   ;;  %s1030_s21 = sphi %s1080_s21, %s1380_s21   ;;  %s1026_s20 = sphi %s1078_s20, %s1379_s20   ;;  %s1022_s19 = sphi %s1076_s19, %s1341_s19   ;;  %s1018_s18 = sphi %s1074_s18, %s1384_s18   ;;  %s1014_s17 = sphi %s1072_s17, %s1383_s17   ;;  %s1010_s16 = sphi %s1070_s16, %s1382_s16   ;;  %s1006_s15 = sphi %s1068_s15, %s1381_s15  }
   0xe   : > { %s681_s24 = sadd.s32 4294967294, %s1034_s22   ;;  %s39_s25 = sadd.s32 1, %s1030_s21 }
   0xf   : > { %p41_p0 = scmp.ge.s32.totalorder %s39_s25, 2  ;;  %p1003_p1 = scmp.ne.s32.totalorder %s1022_s19, 0 }
  0x10   : > { %p60_p2 = scmp.eq.s32.totalorder %s1034_s22, 0  ;;  %p65_p3 = scmp.ne.s32.totalorder %s1022_s19, %s1018_s18 }
  0x11   : > { %s1386_s25 = smov (%p41_p0, %s39_s25), 0  ;;  %p66_p5 = scmp.eq.s32.totalorder %s1107_s23, 0 }
  0x12   : > { %1362 = sst [smem:[#allocation18_spill]] %s1386_s25  ;;  %p1116_p4 = por %p1003_p1, %p60_p2 }
  0x13   : > { %p1121_p6 = por %p66_p5, %p65_p3  ;;  %s139_s28 = ssub.s32 %s1030_s21, %s1386_s25 }
  0x14   : > { %p140_p7 = scmp.eq.s32.totalorder %s139_s28, 0  ;;  %s142_s29 = sadd.s32 1, %s1014_s17 }
  0x15   : > { %s1364_s27 = scalar_select %p1121_p6, 1, 0 }
  0x16   : > { %s1129_s30 = scalar_select %p140_p7, %s1014_s17, %s142_s29  }
  0x17   : > { %p152_p8 = scmp.ne.s32.totalorder %s1014_s17, %s1010_s16  ;;  %p153_p9 = scmp.eq.s32.totalorder %s1107_s23, 1 }
  0x18   : > { %p158_p10 = scmp.ne.s32.totalorder %s1010_s16, %s1006_s15  ;;  %p159_p11 = scmp.eq.s32.totalorder %s681_s24, 1 }
  0x19   : > { %p1136_p12 = por %p153_p9, %p152_p8  ;;  %p739_p1 = scmp.lt.s32.totalorder %s1034_s22, 2 }
  0x1a   : > { %p1141_p0 = por %p159_p11, %p158_p10  ;;  %s227_s8 = sand.u32 1, %s1034_s22  }
  0x1b   : > { %s1365_s5 = scalar_select %p1136_p12, 1, 0 }
  0x1c   : > { %s1366_s6 = scalar_select %p1141_p0, 1, 0 }
  0x1d   : > { %p1148_p2 = pnand %p739_p1, %p1116_p4  ;;  %s1036_s9 = smov [#allocation7]  }
  0x1e   : > { %s242_s10 = sshll.u32 %s1036_s9, 4  ;;  %s1154_s11 = scalar_lea.sflag [#allocation8], %s227_s8  ;;  %s243_s10 = int_to_ptr.vmem [resolvable:$true] %s242_s10 }
  0x1f   : > { %s1368_s1 = sld [smem:[#allocation19_spill]]  ;;  %p1164_p4 = pneg %p1148_p2 }
  0x25   : > { %s815_s14 = scalar_lea.hbm %s1368_s1, 64 }
  0x26   : > { %p816_p5 = scmp.ne.s32.totalorder %s1368_s1, %s815_s14  ;;  %p822_p9 = scmp.lt.s32.totalorder %s815_s14, %s815_s14 }
  0x28   : > { %p818_p7 = pnand %p1164_p4, %p816_p5 }
  0x2a   : > { %p819_p8 = pneg %p818_p7 }
  0x2c   : > { %p824_p10 = pnand %p822_p9, %p819_p8 }
  0x2e   : > { %827 = shalt.err (!%p824_p10)
}
  0x2f   : > { %s828_s28 = scalar_lea.vmem %s243_s10, 64  ;;  %s835_s29 = scalar_lea.vmem %s243_s10, 128 }
  0x30   : > { %p829_p11 = scmp.ne.s32.totalorder %s243_s10, %s828_s28  ;;  %p836_p3 = scmp.lt.s32.totalorder %s243_s10, %s243_s10 }
  0x31   : > { %p837_p0 = scmp.lt.s32.totalorder %s835_s29, %s828_s28 }
  0x32   : > { %p831_p1 = pnand %p829_p11, %p1164_p4 }
  0x33   : > { %p838_p12 = por %p837_p0, %p836_p3 }
  0x34   : > { %p832_p13 = pneg %p831_p1 }
  0x36   : > { %p839_p6 = pnand %p838_p12, %p832_p13 }
  0x38   : > { %842 = shalt.err (!%p839_p6)
}
  0x39   : > { %728 = dma.hbm_to_vmem [thread:$0]  (!%p1148_p2), %s1368_s1, 64, %s243_s10, %s1154_s11  }
  0x3a   : > { %p269_p5 = scmp.lt.s32.totalorder %s1034_s22, 3  ;;  %p1370_p7 = scmp.ge.s32.totalorder %s1034_s22, 1 }
  0x3b   : > { %s1037_s13 = smov [#allocation4]   ;;  %s843_s28 = scalar_lea.hbm %s1351_s0, 64 }
  0x3c   : > { %p1181_p8 = pnand %p1370_p7, %p269_p5  ;;  %s220_s14 = sshll.u32 %s1037_s13, 4  ;;  %s221_s14 = int_to_ptr.vmem [resolvable:$true] %s220_s14 }
  0x3d   : > { %p844_p6 = scmp.ne.s32.totalorder %s1351_s0, %s843_s28  ;;  %p850_p0 = scmp.lt.s32.totalorder %s843_s28, %s843_s28 }
  0x3e   : > { %s1371_s12 = scalar_select %p1181_p8, 1, 0 }
  0x3f   : > { %p846_p12 = pnand %p844_p6, %p1164_p4 }
  0x41   : > { %p847_p13 = pneg %p846_p12 }
  0x43   : > { %p852_p3 = pnand %p850_p0, %p847_p13 }
  0x45   : > { %855 = shalt.err (!%p852_p3)
}
  0x46   : > { %s856_s10 = scalar_lea.vmem %s221_s14, 64  ;;  %s863_s8 = scalar_lea.vmem %s221_s14, 128 }
  0x47   : > { %p857_p9 = scmp.ne.s32.totalorder %s221_s14, %s856_s10  ;;  %p864_p1 = scmp.lt.s32.totalorder %s221_s14, %s221_s14 }
  0x48   : > { %p865_p5 = scmp.lt.s32.totalorder %s863_s8, %s856_s10 }
  0x49   : > { %p859_p10 = pnand %p857_p9, %p1164_p4 }
  0x4a   : > { %p866_p7 = por %p865_p5, %p864_p1 }
  0x4b   : > { %p860_p11 = pneg %p859_p10 }
  0x4d   : > { %p867_p8 = pnand %p866_p7, %p860_p11 }
  0x4f   : > { %870 = shalt.err (!%p867_p8)
}
  0x50   : > { %725 = dma.hbm_to_vmem [thread:$0]  (!%p1148_p2), %s1351_s0, 64, %s221_s14, [#allocation5]  }
  0x51   : > { %s1038_s13 = smov [#allocation9]   ;;  %s871_s29 = scalar_lea.hbm %s1353_s2, 64 }
  0x52   : > { %s264_s18 = sshll.u32 %s1038_s13, 4  ;;  %p872_p6 = scmp.ne.s32.totalorder %s1353_s2, %s871_s29  ;;  %s265_s18 = int_to_ptr.vmem [resolvable:$true] %s264_s18 }
  0x53   : > { %p878_p13 = scmp.lt.s32.totalorder %s871_s29, %s871_s29 }
  0x54   : > { %p874_p8 = pnand %p872_p6, %p1164_p4 }
  0x56   : > { %p875_p12 = pneg %p874_p8 }
  0x58   : > { %p880_p0 = pnand %p878_p13, %p875_p12 }
  0x5a   : > { %883 = shalt.err (!%p880_p0)
}
  0x5b   : > { %s884_s10 = scalar_lea.vmem %s265_s18, 64  ;;  %s891_s14 = scalar_lea.vmem %s265_s18, 128 }
  0x5c   : > { %p885_p3 = scmp.ne.s32.totalorder %s265_s18, %s884_s10  ;;  %p892_p11 = scmp.lt.s32.totalorder %s265_s18, %s265_s18 }
  0x5d   : > { %p893_p1 = scmp.lt.s32.totalorder %s891_s14, %s884_s10 }
  0x5e   : > { %p887_p9 = pnand %p885_p3, %p1164_p4 }
  0x5f   : > { %p894_p5 = por %p893_p1, %p892_p11 }
  0x60   : > { %p888_p10 = pneg %p887_p9 }
  0x62   : > { %p895_p7 = pnand %p894_p5, %p888_p10 }
  0x64   : > { %898 = shalt.err (!%p895_p7)
}
  0x65   : > { %731 = dma.hbm_to_vmem [thread:$0]  (!%p1148_p2), %s1353_s2, 64, %s265_s18, %s1154_s11  }
  0x66   : > { %p1372_p6 = scmp.ne.s32.totalorder %s1371_s12, 0 }
  0x67   : > { %s275_s26 = sand.u32 (!%p1372_p6), 1, %s1022_s19   ;;  %p1373_p4 = scmp.ne.s32.totalorder (!%p1372_p6), %s1364_s27, 0 }
  0x68   : > { %273 = sbr.rel (%p1372_p6) target bundleno = 176 (0xb0), region = 32  ;;  %s1219_s8 = sshll.u32 (!%p1372_p6), %s275_s26, 2 }
  0x69   : > { %s276_s25 = scalar_lea.sflag (!%p1372_p6), [#allocation5], %s275_s26  ;;  %s279_s9 = scalar_lea.vmem (!%p1372_p6), [#allocation4], %s1219_s8 }
  0x6d   : > { %988 = dma.done.wait (%p1373_p4), %s276_s25, 64  }
  0x6e   : > { %990 = vsyncadd (%p1373_p4), %s276_s25, 4294967232  ;;  %s284_s7 = sand.u32 1, %s1107_s23   ;;  %s288_s12 = scalar_lea.vmem [#allocation7], %s1219_s8 }
  0x6f   : > { %s285_s11 = scalar_lea.sflag [#allocation8], %s284_s7 }
  0x70   : > { %992 = dma.done.wait (%p1373_p4), %s285_s11, 128  }
  0x71   : > { %994 = vsyncadd (%p1373_p4), %s285_s11, 4294967168  ;;  %v350_v0 = vlaneseq  ;;  %v365_v1 = vstv %s1026_s20  ;;  %v1039_v2 = vmov 1966171168   ;;  %v1040_v6 = vmov 0.0   ;;  %v356_v13 = vld [vmem:[%s279_s9] sm:$0xf] }
  0x72   : > { %v426_v3 = vunpack.c.l.s4 %v1039_v2  ;;  %v357_v14 = vld [vmem:[%s288_s12] sm:$0xf]  ;;  %s297_s23 = scalar_lea.vmem [#allocation9], %s1219_s8  ;;  %s1251_s27 = sand.u32 1, %s1010_s16  }
  0x73   : > { %vm1233_vm0 = vcmp.lt.s32.totalorder %v350_v0, 512  ;;  %v364_v5 = vshrl.u32 %v350_v0, 7  ;;  %v358_v15 = vld [vmem:[%s297_s23] sm:$0xf]  ;;  %v359_v16 = vsub.f32 %v356_v13, %v357_v14  ;;  %s697_s13 = sshll.u32 %s1251_s27, 2  ;;  %s710_s28 = sshll.u32 %s1026_s20, 6 }
  0x74   : > { %354 = vst.msk [vmem:[#allocation2] sm:$0xf] %vm1233_vm0, %v1040_v6  ;;  %355 = vst.msk [vmem:[#allocation3] sm:$0xf] %vm1233_vm0, %v1040_v6  ;;  %v427_v12 = vunpack.c.0.s8 %v426_v3  ;;  %s336_s18 = scalar_lea.vmem [#allocation11], %s697_s13  ;;  %s1266_s14 = scalar_lea.hbm %s1355_s4, %s710_s28 }
  0x75   : > { %v366_v7 = vadd.s32 %v365_v1, %v364_v5  ;;  %v371_v8 = vsub.s32 0, %v364_v5  ;;  %v375_v9 = vsub.s32 1, %v364_v5  ;;  %v379_v10 = vsub.s32 2, %v364_v5  ;;  %s527_s24 = sshll.u32 %s336_s18, 4  ;;  %s1268_s1 = scalar_lea.vmem [#allocation10], %s697_s13  ;;  %s1259_s24 = int_to_ptr.vmem [resolvable:$true] %s527_s24 }
  0x76   : > { %v383_v11 = vsub.s32 3, %v364_v5  ;;  %v430_v20 = vsub.s32 %v427_v12, %v364_v5  ;;  %v360_v22 = vmul.f32 %v359_v16, %v359_v16  ;;  %s513_s21 = sshll.u32 %s1268_s1, 4  ;;  %s499_s26 = scalar_lea.sflag [#allocation12], %s1251_s27  ;;  %s1296_s21 = int_to_ptr.vmem [resolvable:$true] %s513_s21 }
  0x77   : > { %vm367_vm1 = vcmp.lt.s32.totalorder %v366_v7, 1  ;;  %v397_v17 = vrot.slane %v358_v15, %v371_v8  ;;  %v401_v18 = vrot.slane %v358_v15, %v375_v9  ;;  %v405_v19 = vrot.slane %v358_v15, %v379_v10  ;;  %s899_s8 = scalar_lea.vmem %s1259_s24, 64  ;;  %p1376_p8 = scmp.ne.s32.totalorder %s1365_s5, 0 }
  0x78   : > { %v409_v21 = vrot.slane %v358_v15, %v383_v11  ;;  %v361_v28 = vmul.f32 %v360_v22, %v358_v15  ;;  %p900_p2 = scmp.ne.s32.totalorder %s1259_s24, %s899_s8  ;;  %s1041_s25 = smov [#allocation11]  }
  0x79   : > { %v414_v23 = vsel %vm367_vm1, %v397_v17, 0.0  ;;  %v415_v24 = vsel %vm367_vm1, %v401_v18, 0.0  ;;  %v416_v25 = vsel %vm367_vm1, %v405_v19, 0.0  ;;  %s903_s9 = sshll.u32 %s1041_s25, 4  ;;  %s904_s9 = int_to_ptr.vmem [resolvable:$false] %s903_s9 }
  0x7a   : > { %v417_v26 = vsel %vm367_vm1, %v409_v21, 0.0  ;;  %v459_v27 = vcombine.low %v414_v23, %v415_v24  ;;  %v372_v31 = vrot.slane %v361_v28, %v371_v8  ;;  %v376_v32 = vrot.slane %v361_v28, %v375_v9  ;;  %p901_p12 = pnand %p900_p2, %p1376_p8  ;;  %s905_s7 = scalar_lea.vmem %s904_s9, 128 }
  0x7b   : > { %v460_v29 = vcombine.low %v416_v25, %v417_v26  ;;  %v380_v33 = vrot.slane %v361_v28, %v379_v10  ;;  %v384_v34 = vrot.slane %v361_v28, %v383_v11  ;;  %v454_v43 = vld [vmem:[#allocation3] sm:$0xf]  ;;  %v418_v49 = vld [vmem:[#allocation2] sm:$0xf]  ;;  %p906_p0 = scmp.lt.s32.totalorder %s1259_s24, %s904_s9  ;;  %p907_p3 = scmp.lt.s32.totalorder %s905_s7, %s899_s8 }
  0x7c   : > { %v467_v30 = vrot.slane %v459_v27, %v430_v20  ;;  %v389_v36 = vsel %vm367_vm1, %v372_v31, 0.0  ;;  %v390_v37 = vsel %vm367_vm1, %v376_v32, 0.0  ;;  %p902_p13 = pneg %p901_p12 }
  0x7d   : > { %v474_v35 = vrot.slane %v460_v29, %v430_v20  ;;  %v391_v38 = vsel %vm367_vm1, %v380_v33, 0.0  ;;  %v392_v39 = vsel %vm367_vm1, %v384_v34, 0.0  ;;  %v423_v40 = vcombine.low %v389_v36, %v390_v37  ;;  %p908_p9 = por %p907_p3, %p906_p0 }
  0x7e   : > { %v424_v41 = vcombine.low %v391_v38, %v392_v39 }
  0x7f   : > { %v475_v42 = vcombine.low %v467_v30, %v474_v35  ;;  %v431_v44 = vrot.slane %v423_v40, %v430_v20  ;;  %p909_p10 = pnand %p908_p9, %p902_p13 }
  0x80   : > { %v438_v45 = vrot.slane %v424_v41, %v430_v20 }
  0x81   : > { %v482_v46 = vrot.slane %v475_v42, %v430_v20 }
  0x82   : > { %v439_v47 = vcombine.low %v431_v44, %v438_v45 }
  0x83   : > { %v484_v48 = vadd.f32 %v482_v46, %v454_v43 }
  0x84   : > { %v446_v50 = vrot.slane %v439_v47, %v430_v20 }
  0x85   : > { %485 = vst.msk [vmem:[#allocation3] sm:$0xf] %vm1233_vm0, %v484_v48 }
  0x86   : > { %v448_v51 = vadd.f32 %v446_v50, %v418_v49 }
  0x88   : > { %453 = vst.msk [vmem:[#allocation2] sm:$0xf] %vm1233_vm0, %v448_v51 }
  0x8c   : > { %v491_v52 = vld [vmem:[#allocation3] sm:$0xf] }
  0x8d   : > { %492 = vst.msk [vmem:[%s336_s18] sm:$0xf] %vm1233_vm0, %v491_v52 }
  0x8e   : > { %912 = shalt.err (!%p909_p10)
}
  0x8f   : > { %s913_s11 = scalar_lea.hbm %s1266_s14, 64  ;;  %s917_s13 = scalar_lea.hbm %s1355_s4, 128 }
  0x90   : > { %p914_p11 = scmp.ne.s32.totalorder %s1266_s14, %s913_s11  ;;  %p918_p7 = scmp.lt.s32.totalorder %s1266_s14, %s1355_s4 }
  0x91   : > { %p919_p6 = scmp.lt.s32.totalorder %s917_s13, %s913_s11 }
  0x92   : > { %p915_p1 = pnand %p914_p11, %p1376_p8 }
  0x93   : > { %p920_p4 = por %p919_p6, %p918_p7 }
  0x94   : > { %p916_p5 = pneg %p915_p1 }
  0x96   : > { %p921_p2 = pnand %p920_p4, %p916_p5 }
  0x98   : > { %924 = shalt.err (!%p921_p2)
}
  0x99   : > { %719 = dma.vmem_to_hbm [thread:$0]  (%p1376_p8), %s1259_s24, 64, %s1266_s14, %s499_s26   ;;  %v489_v53 = vld [vmem:[#allocation2] sm:$0xf] }
  0x9a   : > { %s511_s25 = scalar_lea.hbm %s1354_s3, %s710_s28  ;;  %490 = vst.msk [vmem:[%s1268_s1] sm:$0xf] %vm1233_vm0, %v489_v53  ;;  %s494_s9 = scalar_lea.sflag [#allocation6], %s1251_s27 }
  0x9b   : > { %s925_s7 = scalar_lea.vmem %s1296_s21, 64  ;;  %s1042_s24 = smov [#allocation10]  }
  0x9c   : > { %p926_p12 = scmp.ne.s32.totalorder %s1296_s21, %s925_s7  ;;  %s929_s14 = sshll.u32 %s1042_s24, 4  ;;  %s930_s14 = int_to_ptr.vmem [resolvable:$false] %s929_s14 }
  0x9d   : > { %s931_s20 = scalar_lea.vmem %s930_s14, 128  ;;  %p932_p3 = scmp.lt.s32.totalorder %s1296_s21, %s930_s14 }
  0x9e   : > { %p927_p13 = pnand %p926_p12, %p1376_p8  ;;  %p933_p9 = scmp.lt.s32.totalorder %s931_s20, %s925_s7 }
  0xa0   : > { %p928_p0 = pneg %p927_p13  ;;  %p934_p10 = por %p933_p9, %p932_p3 }
  0xa2   : > { %p935_p11 = pnand %p934_p10, %p928_p0 }
  0xa4   : > { %938 = shalt.err (!%p935_p11)
}
  0xa5   : > { %s939_s28 = scalar_lea.hbm %s511_s25, 64  ;;  %s943_s26 = scalar_lea.hbm %s1354_s3, 128 }
  0xa6   : > { %p940_p1 = scmp.ne.s32.totalorder %s511_s25, %s939_s28  ;;  %p944_p6 = scmp.lt.s32.totalorder %s511_s25, %s1354_s3 }
  0xa7   : > { %p945_p4 = scmp.lt.s32.totalorder %s943_s26, %s939_s28 }
  0xa8   : > { %p941_p5 = pnand %p940_p1, %p1376_p8 }
  0xa9   : > { %p946_p2 = por %p945_p4, %p944_p6 }
  0xaa   : > { %p942_p7 = pneg %p941_p5 }
  0xac   : > { %p947_p12 = pnand %p946_p2, %p942_p7 }
  0xae   : > { %950 = shalt.err (!%p947_p12)
}
  0xaf   : > { %718 = dma.vmem_to_hbm [thread:$0]  (%p1376_p8), %s1296_s21, 64, %s511_s25, %s494_s9  }
  0xb0 PF: > { %s539_s23 = sand.u32 1, %s1006_s15   ;;  %p1377_p13 = scmp.ne.s32.totalorder %s1366_s6, 0 }
  0xb1   : > { %p1378_p0 = scmp.ge.s32.totalorder %s1034_s22, 2  ;;  %s540_s13 = scalar_lea.sflag [#allocation6], %s539_s23 }
  0xb3   : > { %p733_p3 = pnand %p1378_p0, %p1377_p13 }
  0xb5   : > { %p734_p9 = pneg %p733_p3 }
  0xb7   : > { %996 = dma.done.wait (%p734_p9), %s540_s13, 64  }
  0xb8   : > { %998 = vsyncadd (%p734_p9), %s540_s13, 4294967232  ;;  %s549_s18 = scalar_lea.sflag [#allocation12], %s539_s23 }
  0xb9   : > { %1000 = dma.done.wait (%p734_p9), %s549_s18, 64  }
  0xba   : > { %1002 = vsyncadd (%p734_p9), %s549_s18, 4294967232  ;;  %s27_s22 = sadd.s32 1, %s1034_s22   ;;  %s1379_s20 = sld [smem:[#allocation17_spill]] }
  0xbb   : > { %p24_p10 = scmp.ge.s32.totalorder %s27_s22, 4   ;;  %s1380_s21 = sld [smem:[#allocation18_spill]] }
  0xbc   : > { %s1381_s15 = smov %s1010_s16  ;;  %s1382_s16 = smov %s1014_s17 }
  0xbd   : > { %s1383_s17 = smov %s1129_s30  ;;  %s1384_s18 = smov %s1022_s19 }
  0xbe   : > { %s1341_s19 = smov 0   ;;  %26 = sbr.rel (!%p24_p10) target bundleno = 13 (0xd), region = 126 }
  0xc3   :  { %554 = vsyncpa [#allocation5], 1 }
  0xc4   :  { %556 = vsyncpa [#allocation5 + $0x1], 1 }
  0xc5   :  { %557 = vsyncpa [#allocation8], 1 }
  0xc6   :  { %559 = vsyncpa [#allocation8 + $0x1], 1 }
  0xc7   :  { %560 = vsyncpa [#allocation6], 1 }
  0xc8   :  { %562 = vsyncpa [#allocation6 + $0x1], 1 }
  0xc9   :  { %563 = vsyncpa [#allocation12], 1 }
  0xca   :  { %565 = vsyncpa [#allocation12 + $0x1], 1 }

</bundles_post_ra>
